<compile_context>
chip_gen: v6e
topology: v6e:2x2x1
jax: 0.10.0
libtpu: 0.0.40
codegen_flags: <defaults>
</compile_context>

<pallas_src>
import jax
import jax.numpy as jnp
import numpy as np
from jax.experimental import pallas as pl
from jax.experimental.pallas import tpu as pltpu

EPS = 1e-5
LANE = 128
VMEM_LIMIT = 32 * 1024 * 1024  # safe on v5e/v6e/v7x scoped-VMEM budgets


def _round_up(x, m):
    return (x + m - 1) // m * m


# ---- Pass 1: conv-as-GEMM + per-channel sum / sum-of-squares accumulation -----------
def gemm_stats_kernel(patches_ref, w_ref, y_ref, sum_ref, sq_ref):
    # patches: (TM, PP) bf16 | w: (PP, CP) bf16 | y: (TM, CP) f32
    # sum/sq : (1, CP) f32, resident across the grid (accumulator pattern).
    @pl.when(pl.program_id(0) == 0)
    def _():
        sum_ref[...] = jnp.zeros_like(sum_ref)
        sq_ref[...] = jnp.zeros_like(sq_ref)

    y = jnp.dot(patches_ref[...], w_ref[...], preferred_element_type=jnp.float32)
    y_ref[...] = y
    sum_ref[...] += jnp.sum(y, axis=0, keepdims=True)
    sq_ref[...] += jnp.sum(y * y, axis=0, keepdims=True)


# ---- Pass 2: folded BatchNorm affine + ReLU ------------------------------------------
def norm_relu_kernel(y_ref, scale_ref, shift_ref, out_ref):
    out_ref[...] = jnp.maximum(y_ref[...] * scale_ref[...] + shift_ref[...], 0.0)


def conv_block_forward(x_nchw, weight, bias, gamma, beta, padding=1, stride=1, tm=256):
    """ConvBlock forward (training-mode BatchNorm). weight: (Cout, Cin, K, K) OIHW."""
    del bias  # cancels exactly under training-mode BatchNorm mean subtraction
    assert stride == 1, "demo covers stride=1 (the module's default)"
    N, Cin, H, W = x_nchw.shape
    Cout, _, K, _ = weight.shape

    # ---- layout plumbing in plain JAX: NCHW -> NHWC, spatial pad, im2col -------------
    x = jnp.transpose(x_nchw, (0, 2, 3, 1)).astype(jnp.float32)
    xp = jnp.pad(x, ((0, 0), (padding, padding), (padding, padding), (0, 0)))
    Ho = H + 2 * padding - K + 1
    Wo = W + 2 * padding - K + 1
    slabs = [xp[:, kh:kh + Ho, kw:kw + Wo, :] for kh in range(K) for kw in range(K)]
    patches = jnp.stack(slabs, axis=3).reshape(N * Ho * Wo, K * K * Cin)
    # TODO(synk): for large images replace im2col with K*K shifted (Ho*Wo,Cin)x(Cin,Cout)
    # matmuls inside the kernel to cut HBM traffic ~K*K-fold.

    M, P = patches.shape
    PP = _round_up(P, LANE)       # lane-dense MXU contraction dim
    CP = _round_up(Cout, LANE)    # lane-dense output channels (un-masked stores)
    MP = _round_up(M, tm)         # row axis padded to a tile multiple

    patches_p = jnp.pad(patches, ((0, MP - M), (0, PP - P))).astype(jnp.bfloat16)
    w2d = jnp.transpose(weight, (2, 3, 1, 0)).reshape(P, Cout).astype(jnp.float32)
    w_p = jnp.pad(w2d, ((0, PP - P), (0, CP - Cout))).astype(jnp.bfloat16)

    grid = (MP // tm,)

    y, ssum, ssq = pl.pallas_call(
        gemm_stats_kernel,
        out_shape=(
            jax.ShapeDtypeStruct((MP, CP), jnp.float32),
            jax.ShapeDtypeStruct((1, CP), jnp.float32),
            jax.ShapeDtypeStruct((1, CP), jnp.float32),
        ),
        grid=grid,
        in_specs=[
            pl.BlockSpec((tm, PP), lambda i: (i, 0)),
            pl.BlockSpec((PP, CP), lambda i: (0, 0)),
        ],
        out_specs=(
            pl.BlockSpec((tm, CP), lambda i: (i, 0)),
            pl.BlockSpec((1, CP), lambda i: (0, 0)),
            pl.BlockSpec((1, CP), lambda i: (0, 0)),
        ),
        compiler_params=pltpu.CompilerParams(
            dimension_semantics=("arbitrary",),        # resident stat accumulators
            vmem_limit_bytes=VMEM_LIMIT,
        ),
    )(patches_p, w_p)

    # Batch statistics (biased variance, like nn.BatchNorm2d train mode), folded into a
    # single per-channel scale/shift — tiny (1, CP) math, done once in plain JAX.
    mean = ssum / M
    var = jnp.maximum(ssq / M - mean * mean, 0.0)
    gamma_p = jnp.pad(gamma.reshape(1, Cout).astype(jnp.float32), ((0, 0), (0, CP - Cout)))
    beta_p = jnp.pad(beta.reshape(1, Cout).astype(jnp.float32), ((0, 0), (0, CP - Cout)))
    scale = gamma_p / jnp.sqrt(var + EPS)
    shift = beta_p - mean * scale

    out_flat = pl.pallas_call(
        norm_relu_kernel,
        out_shape=jax.ShapeDtypeStruct((MP, CP), jnp.float32),
        grid=grid,
        in_specs=[
            pl.BlockSpec((tm, CP), lambda i: (i, 0)),
            pl.BlockSpec((1, CP), lambda i: (0, 0)),
            pl.BlockSpec((1, CP), lambda i: (0, 0)),
        ],
        out_specs=pl.BlockSpec((tm, CP), lambda i: (i, 0)),
        compiler_params=pltpu.CompilerParams(
            dimension_semantics=("parallel",),         # independent tiles -> 2 TCs on v7x
            vmem_limit_bytes=VMEM_LIMIT,
        ),
    )(y, scale, shift)

    # Slice off channel/row padding, back to NCHW (PyTorch convention).
    return out_flat[:M, :Cout].reshape(N, Ho, Wo, Cout).transpose(0, 3, 1, 2)


def _reference(x, weight, bias, gamma, beta, padding=1, gemm_dtype=jnp.float32):
    y = jax.lax.conv_general_dilated(
        x.astype(gemm_dtype), weight.astype(gemm_dtype),
        window_strides=(1, 1), padding=((padding, padding), (padding, padding)),
        dimension_numbers=("NCHW", "OIHW", "NCHW"),
        preferred_element_type=jnp.float32,
    ) + bias.reshape(1, -1, 1, 1)
    mean = y.mean(axis=(0, 2, 3), keepdims=True)
    var = ((y - mean) ** 2).mean(axis=(0, 2, 3), keepdims=True)
    z = (y - mean) / jnp.sqrt(var + EPS) * gamma.reshape(1, -1, 1, 1) + beta.reshape(1, -1, 1, 1)
    return jnp.maximum(z, 0.0)


if __name__ == "__main__":
    # ConvBlock(in_channels=4, out_chanels=8, kernel_size=3, padding=1)
    N, Cin, Cout, H, W, K = 2, 4, 8, 16, 16, 3
    key = jax.random.PRNGKey(0)
    k1, k2, k3, k4, k5 = jax.random.split(key, 5)

    x = jax.random.normal(k1, (N, Cin, H, W), jnp.float32)
    weight = 0.1 * jax.random.normal(k2, (Cout, Cin, K, K), jnp.float32)   # conv.weight
    bias = 0.1 * jax.random.normal(k3, (Cout,), jnp.float32)               # conv.bias
    gamma = 1.0 + 0.1 * jax.random.normal(k4, (Cout,), jnp.float32)        # bn.weight
    beta = 0.1 * jax.random.normal(k5, (Cout,), jnp.float32)               # bn.bias

    out = conv_block_forward(x, weight, bias, gamma, beta, padding=1, tm=256)
    jax.block_until_ready(out)

    # Tight check against a reference whose conv inputs are quantized to the same bf16
    # the kernel feeds the MXU (validates the kernel math itself)...
    ref_bf16 = _reference(x, weight, bias, gamma, beta, padding=1, gemm_dtype=jnp.bfloat16)
    np.testing.assert_allclose(np.asarray(out), np.asarray(ref_bf16), atol=2e-4, rtol=2e-4)
    # ...and against the pure-f32 PyTorch-module semantics (bf16 quantization noise only).
    ref_f32 = _reference(x, weight, bias, gamma, beta, padding=1, gemm_dtype=jnp.float32)
    np.testing.assert_allclose(np.asarray(out), np.asarray(ref_f32), atol=5e-2)

    print("KERNEL_OK")
</pallas_src>

<mosaic_0001>
module attributes {stable_mosaic.version = 11 : i64} {
  func.func @gemm_stats_kernel(%arg0: i32, %arg1: memref<256x128xbf16, #tpu.memory_space<vmem>>, %arg2: memref<128x128xbf16, #tpu.memory_space<vmem>>, %arg3: memref<256x128xf32, #tpu.memory_space<vmem>>, %arg4: memref<1x128xf32, #tpu.memory_space<vmem>>, %arg5: memref<1x128xf32, #tpu.memory_space<vmem>>) attributes {dimension_semantics = [#tpu.dimension_semantics<arbitrary>], iteration_bounds = array<i64: 2>, scalar_prefetch = 0 : i64, scratch_operands = 0 : i64, tpu.core_type = #tpu.core_type<tc>, window_params = [{transform_indices = @transform_0, window_bounds = array<i64: 256, 128>}, {pipeline_mode = #tpu.pipeline_mode<synchronous>, transform_indices = @transform_1, window_bounds = array<i64: 128, 128>}, {transform_indices = @transform_2, window_bounds = array<i64: 256, 128>}, {pipeline_mode = #tpu.pipeline_mode<synchronous>, transform_indices = @transform_3, window_bounds = array<i64: 1, 128>}, {pipeline_mode = #tpu.pipeline_mode<synchronous>, transform_indices = @transform_4, window_bounds = array<i64: 1, 128>}]} {
    %c0_i32 = arith.constant 0 : i32
    %0 = arith.cmpi eq, %arg0, %c0_i32 : i32
    %1 = arith.extui %0 : i1 to i32
    %c0_i32_0 = arith.constant 0 : i32
    %2 = arith.cmpi ne, %1, %c0_i32_0 : i32
    scf.if %2 {
      %cst_16 = arith.constant 0.000000e+00 : f32
      %18 = vector.broadcast %cst_16 : f32 to vector<1x128xf32>
      %c0_17 = arith.constant 0 : index
      %c0_18 = arith.constant 0 : index
      %19 = vector.load %arg4[%c0_17, %c0_18] : memref<1x128xf32, #tpu.memory_space<vmem>>, vector<1x128xf32>
      tpu.vector_store %arg4[%c0_17, %c0_18], %18 {strides = array<i32>} : memref<1x128xf32, #tpu.memory_space<vmem>>, vector<1x128xf32>,
      %cst_19 = arith.constant 0.000000e+00 : f32
      %20 = vector.broadcast %cst_19 : f32 to vector<1x128xf32>
      %c0_20 = arith.constant 0 : index
      %c0_21 = arith.constant 0 : index
      %21 = vector.load %arg5[%c0_20, %c0_21] : memref<1x128xf32, #tpu.memory_space<vmem>>, vector<1x128xf32>
      tpu.vector_store %arg5[%c0_20, %c0_21], %20 {strides = array<i32>} : memref<1x128xf32, #tpu.memory_space<vmem>>, vector<1x128xf32>,
    } else {
    }
    %c0 = arith.constant 0 : index
    %c0_1 = arith.constant 0 : index
    %3 = vector.load %arg1[%c0, %c0_1] : memref<256x128xbf16, #tpu.memory_space<vmem>>, vector<256x128xbf16>
    %c0_2 = arith.constant 0 : index
    %c0_3 = arith.constant 0 : index
    %4 = vector.load %arg2[%c0_2, %c0_3] : memref<128x128xbf16, #tpu.memory_space<vmem>>, vector<128x128xbf16>
    %cst = arith.constant dense<0.000000e+00> : vector<256x128xf32>
    %5 = tpu.matmul %3, %4, %cst {dimension_numbers = #tpu.dot_dimension_numbers<[1], [0], [0], [1], [0, 0, 1, 1], [], []>} : vector<256x128xbf16>, vector<128x128xbf16>, vector<256x128xf32> -> vector<256x128xf32>
    %c0_4 = arith.constant 0 : index
    %c0_5 = arith.constant 0 : index
    %6 = vector.load %arg3[%c0_4, %c0_5] : memref<256x128xf32, #tpu.memory_space<vmem>>, vector<256x128xf32>
    tpu.vector_store %arg3[%c0_4, %c0_5], %5 {strides = array<i32>} : memref<256x128xf32, #tpu.memory_space<vmem>>, vector<256x128xf32>,
    %c0_6 = arith.constant 0 : index
    %c0_7 = arith.constant 0 : index
    %7 = vector.load %arg4[%c0_6, %c0_7] : memref<1x128xf32, #tpu.memory_space<vmem>>, vector<1x128xf32>
    %cst_8 = arith.constant dense<0.000000e+00> : vector<128xf32>
    %8 = vector.multi_reduction <add>, %5, %cst_8 [0] : vector<256x128xf32> to vector<128xf32>
    %9 = vector.shape_cast %8 : vector<128xf32> to vector<1x128xf32>
    %10 = arith.addf %7, %9 : vector<1x128xf32>
    %c0_9 = arith.constant 0 : index
    %c0_10 = arith.constant 0 : index
    %11 = vector.load %arg4[%c0_9, %c0_10] : memref<1x128xf32, #tpu.memory_space<vmem>>, vector<1x128xf32>
    tpu.vector_store %arg4[%c0_9, %c0_10], %10 {strides = array<i32>} : memref<1x128xf32, #tpu.memory_space<vmem>>, vector<1x128xf32>,
    %c0_11 = arith.constant 0 : index
    %c0_12 = arith.constant 0 : index
    %12 = vector.load %arg5[%c0_11, %c0_12] : memref<1x128xf32, #tpu.memory_space<vmem>>, vector<1x128xf32>
    %13 = arith.mulf %5, %5 : vector<256x128xf32>
    %cst_13 = arith.constant dense<0.000000e+00> : vector<128xf32>
    %14 = vector.multi_reduction <add>, %13, %cst_13 [0] : vector<256x128xf32> to vector<128xf32>
    %15 = vector.shape_cast %14 : vector<128xf32> to vector<1x128xf32>
    %16 = arith.addf %12, %15 : vector<1x128xf32>
    %c0_14 = arith.constant 0 : index
    %c0_15 = arith.constant 0 : index
    %17 = vector.load %arg5[%c0_14, %c0_15] : memref<1x128xf32, #tpu.memory_space<vmem>>, vector<1x128xf32>
    tpu.vector_store %arg5[%c0_14, %c0_15], %16 {strides = array<i32>} : memref<1x128xf32, #tpu.memory_space<vmem>>, vector<1x128xf32>,
    return
  }
  func.func @transform_0(%arg0: i32) -> (i32, i32) {
    %c0_i32 = arith.constant 0 : i32
    %c0_i32_0 = arith.constant 0 : i32
    return %arg0, %c0_i32 : i32, i32
  }
  func.func @transform_1(%arg0: i32) -> (i32, i32) {
    %c0_i32 = arith.constant 0 : i32
    %c0_i32_0 = arith.constant 0 : i32
    %c0_i32_1 = arith.constant 0 : i32
    return %c0_i32, %c0_i32_0 : i32, i32
  }
  func.func @transform_2(%arg0: i32) -> (i32, i32) {
    %c0_i32 = arith.constant 0 : i32
    %c0_i32_0 = arith.constant 0 : i32
    return %arg0, %c0_i32 : i32, i32
  }
  func.func @transform_3(%arg0: i32) -> (i32, i32) {
    %c0_i32 = arith.constant 0 : i32
    %c0_i32_0 = arith.constant 0 : i32
    %c0_i32_1 = arith.constant 0 : i32
    return %c0_i32, %c0_i32_0 : i32, i32
  }
  func.func @transform_4(%arg0: i32) -> (i32, i32) {
    %c0_i32 = arith.constant 0 : i32
    %c0_i32_0 = arith.constant 0 : i32
    %c0_i32_1 = arith.constant 0 : i32
    return %c0_i32, %c0_i32_0 : i32, i32
  }
}

</mosaic_0001>

<bundles_post_ra>
// kernel: tpu_custom_call.1
= control target key start
LH: loop header
LB: loop body
LE: loop exit
PB: predicated region body
PF: predicated region fallthrough
CT: control target
= control target key end

     0   :  { %10 = vsyncpa [#allocation3], 0  ;;  %s1673_s0 = inlined_call_operand.hbm [shape: bf16[512,128], index: 0, kind: input, shape index: {}]   ;;  %s1674_s1 = inlined_call_operand.hbm [shape: bf16[128,128], index: 1, kind: input, shape index: {}]   ;;  %s1675_s2 = inlined_call_operand.hbm [shape: f32[512,128], index: 2, kind: output, shape index: {0}]   ;;  %s1676_s3 = inlined_call_operand.hbm [shape: f32[1,128], index: 3, kind: output, shape index: {1}]   ;;  %s1677_s4 = inlined_call_operand.hbm [shape: f32[1,128], index: 4, kind: output, shape index: {2}]  }
   0x1   :  { %12 = vsyncpa [#allocation3 + $0x1], 0 }
   0x2   :  { %13 = vsyncpa [#allocation6], 0 }
   0x3   :  { %14 = vsyncpa [#allocation4], 0 }
   0x4   :  { %16 = vsyncpa [#allocation4 + $0x1], 0 }
   0x5   :  { %17 = vsyncpa [#allocation9], 0  ;;  %s1319_s15 = smov 0   ;;  %s1321_s16 = smov 0  }
   0x6   :  { %s1323_s17 = smov 0   ;;  %s1325_s18 = smov 0  }
   0x7 LB: > { %s1340_s19 = sadd.s32 4294967295, %s1282_s18   ;;  %s873_s20 = sadd.s32 4294967294, %s1282_s18   ;;  %s1282_s18 = sphi %s1325_s18, %s1706_s18   ;;  %s1278_s17 = sphi %s1323_s17, %s1705_s17   ;;  %s1274_s16 = sphi %s1321_s16, %s1704_s16   ;;  %s1270_s15 = sphi %s1319_s15, %s1703_s15  }
   0x8   : > { %p43_p0 = scmp.ne.s32.totalorder %s1274_s16, %s1270_s15  ;;  %p1678_p1 = scmp.eq.s32.totalorder %s1340_s19, 0 }
   0x9   : > { %p94_p3 = scmp.eq.s32.totalorder %s873_s20, 1  ;;  %p874_p5 = scmp.ge.s32.totalorder %s1282_s18, 1 }
   0xa   : > { %p1349_p4 = por %p1678_p1, %p43_p0  ;;  %p143_p7 = scmp.lt.s32.totalorder %s1282_s18, 3 }
   0xb   : > { %p1354_p6 = por %p94_p3, %p43_p0  ;;  %s1284_s24 = smov [#allocation5]  }
   0xc   : > { %s1682_s21 = scalar_select %p1349_p4, 1, 0 }
   0xd   : > { %s1683_s22 = scalar_select %p1354_p6, 1, 0 }
   0xe   : > { %p1360_p9 = pnand %p874_p5, %p143_p7  ;;  %s155_s25 = sshll.u32 %s1284_s24, 4  ;;  %s156_s25 = int_to_ptr.vmem [resolvable:$true] %s155_s25 }
   0xf   : > { %s1374_s27 = sadd.s32 1, %s1282_s18   ;;  %s30_s28 = sadd.s32 1, %s1278_s17 }
  0x10   : > { %s1684_s23 = scalar_select %p1360_p9, 1, 0 }
  0x11   : > { %p1024_p10 = pneg %p1360_p9  ;;  %s27_s29 = ssub.s32 %s1282_s18, %s1374_s27 }
  0x12   : > { %s1119_s30 = scalar_lea.vmem %s156_s25, 1024  ;;  %p1127_p7 = scmp.lt.s32.totalorder %s156_s25, %s156_s25 }
  0x13   : > { %p1369_p12 = pnand %p1024_p10, %p1678_p1  ;;  %p1120_p0 = scmp.ne.s32.totalorder %s156_s25, %s1119_s30 }
  0x14   : > { %p1128_p8 = scmp.lt.s32.totalorder %s1119_s30, %s1119_s30 }
  0x15   : > { %p1110_p13 = pneg %p1369_p12 }
  0x16   : > { %p1129_p11 = por %p1128_p8, %p1127_p7 }
  0x17   : > { %p1122_p3 = pnand %p1120_p0, %p1110_p13 }
  0x19   : > { %p1123_p5 = pneg %p1122_p3 }
  0x1b   : > { %p1130_p2 = pnand %p1129_p11, %p1123_p5 }
  0x1d   : > { %1133 = shalt.err (!%p1130_p2)
}
  0x1e   : > { %s1285_s5 = smov 64   ;;  %s1286_s6 = smov 4  }
  0x1f   : > { %1027 = dma.hbm_to_vmem [thread:$0]  (!%p1369_p12), %s1674_s1, 1024, %s156_s25, [#allocation6], %s1285_s5, %s1285_s5, %s1286_s6  }
  0x20   : > { %p28_p2 = scmp.eq.s32.totalorder %s27_s29, 0  ;;  %p37_p8 = scmp.ne.s32.totalorder %s1278_s17, %s1274_s16 }
  0x21   : > { %p38_p10 = scmp.eq.s32.totalorder %s1282_s18, 0  ;;  %p1037_p11 = scmp.lt.s32.totalorder %s1282_s18, 2 }
  0x22   : > { %s1394_s9 = scalar_select %p28_p2, %s1278_s17, %s30_s28  }
  0x23   : > { %p39_p13 = por %p38_p10, %p37_p8  ;;  %p1686_p0 = scmp.eq.s32.totalorder %s1340_s19, 1 }
  0x24   : > { %s169_s11 = sand.u32 1, %s1278_s17   ;;  %s918_s12 = sshll.u32 %s1282_s18, 11 }
  0x25   : > { %p1398_p3 = por %p1686_p0, %p37_p8  ;;  %s877_s13 = sshll.u32 %s169_s11, 7 }
  0x26   : > { %s1407_s24 = scalar_lea.hbm %s1673_s0, %s918_s12  ;;  %s173_s25 = scalar_lea.vmem [#allocation2], %s877_s13 }
  0x27   : > { %s1687_s10 = scalar_select %p1398_p3, 1, 0 }
  0x28   : > { %s180_s26 = sshll.u32 %s173_s25, 4  ;;  %p1409_p12 = pnand %p1037_p11, %p39_p13  ;;  %s1413_s26 = int_to_ptr.vmem [resolvable:$true] %s180_s26 }
  0x29   : > { %s1415_s29 = scalar_lea.sflag [#allocation3], %s169_s11  ;;  %s1134_s30 = scalar_lea.hbm %s1407_s24, 2048 }
  0x2a   : > { %p1135_p5 = scmp.ne.s32.totalorder %s1407_s24, %s1134_s30  ;;  %p1136_p7 = pneg %p1409_p12 }
  0x2b   : > { %s1139_s12 = scalar_lea.hbm %s1673_s0, 4096  ;;  %p1140_p10 = scmp.lt.s32.totalorder %s1407_s24, %s1673_s0 }
  0x2c   : > { %p1137_p2 = pnand %p1136_p7, %p1135_p5  ;;  %p1141_p11 = scmp.lt.s32.totalorder %s1139_s12, %s1134_s30 }
  0x2e   : > { %p1138_p8 = pneg %p1137_p2  ;;  %p1142_p13 = por %p1141_p11, %p1140_p10 }
  0x30   : > { %p1143_p0 = pnand %p1142_p13, %p1138_p8 }
  0x32   : > { %1146 = shalt.err (!%p1143_p0)
}
  0x33   : > { %s1147_s11 = scalar_lea.vmem %s1413_s26, 2048  ;;  %s1287_s20 = smov [#allocation2]  }
  0x34   : > { %p1148_p1 = scmp.ne.s32.totalorder %s1413_s26, %s1147_s11  ;;  %s1152_s25 = sshll.u32 %s1287_s20, 4  ;;  %s1153_s25 = int_to_ptr.vmem [resolvable:$false] %s1152_s25 }
  0x35   : > { %s1154_s7 = scalar_lea.vmem %s1153_s25, 4096  ;;  %p1155_p2 = scmp.lt.s32.totalorder %s1413_s26, %s1153_s25 }
  0x36   : > { %p1150_p6 = pnand %p1148_p1, %p1136_p7  ;;  %p1156_p3 = scmp.lt.s32.totalorder %s1154_s7, %s1147_s11 }
  0x38   : > { %p1151_p5 = pneg %p1150_p6  ;;  %p1157_p4 = por %p1156_p3, %p1155_p2 }
  0x3a   : > { %p1158_p9 = pnand %p1157_p4, %p1151_p5 }
  0x3c   : > { %1161 = shalt.err (!%p1158_p9)
}
  0x3d   : > { %1031 = dma.hbm_to_vmem [thread:$0]  (!%p1409_p12), %s1407_s24, 2048, %s1413_s26, %s1415_s29, %s1285_s5, %s1285_s5, %s1286_s6  }
  0x3e   : > { %p1689_p1 = scmp.ne.s32.totalorder %s1684_s23, 0 }
  0x3f   : > { %s1442_s30 = sand.u32 (!%p1689_p1), 1, %s1274_s16   ;;  %p1690_p4 = scmp.ne.s32.totalorder (!%p1689_p1), %s1682_s21, 0 }
  0x40   : > { %192 = sbr.rel (%p1689_p1) target bundleno = 420 (0x1a4), region = 28  ;;  %s881_s8 = sshll.u32 (!%p1689_p1), %s1442_s30, 7 }
  0x41   : > { %s195_s12 = scalar_lea.sflag (!%p1689_p1), [#allocation3], %s1442_s30  ;;  %s1446_s13 = scalar_lea.vmem (!%p1689_p1), [#allocation2], %s881_s8 }
  0x45   : > { %1253 = dma.done.wait (%p1690_p4), %s195_s12, 2048  }
  0x46   : > { %1255 = vsyncadd (%p1690_p4), %s195_s12, 4294965248  ;;  %p1691_p6 = scmp.eq.s32.totalorder %s1340_s19, 0 }
  0x48   : > { %1257 = dma.done.wait (%p1691_p6), [#allocation6], 1024   ;;  %p1692_p9 = pmov %p1691_p6 }
  0x49   : > { %s883_s23 = sshll.u32 %s1442_s30, 8  ;;  %p1693_p3 = scmp.ne.s32.totalorder %s1340_s19, 0 }
  0x4a   : > { %1259 = vsyncadd (%p1692_p9), [#allocation6], 4294966272  ;;  %s1457_s5 = scalar_lea.vmem [#allocation7], %s883_s23 }
  0x4b   : > { %233 = sbr.rel (%p1693_p3) target bundleno = 82 (0x52), region = 40 }
  0x50   : > { %v1288_v0 = vmov 0.0  }
  0x51   : > { %234 = vst [vmem:[#allocation8] sm:$0x1] %v1288_v0  ;;  %235 = vst [vmem:[#allocation10] sm:$0x1] %v1288_v0 }
  0x52 PF: > { %v1084_v1 = vld [vmem:[#allocation5 + $0x38] sm:$0xff]   ;;  %v1085_v2 = vld [vmem:[#allocation5 + $0x30] sm:$0xff]   ;;  %v1086_v3 = vld [vmem:[#allocation5 + $0x28] sm:$0xff]   ;;  %s919_s21 = sshll.u32 %s1340_s19, 12  ;;  %s747_s6 = sshll.u32 %s1457_s5, 4  ;;  %s1556_s6 = int_to_ptr.vmem [resolvable:$true] %s747_s6 }
  0x53   : > { %944 = vmatprep.subr.bf16.mxu0 %v1084_v1  ;;  %992 = vmatprep.subr.bf16.mxu1 %v1084_v1  ;;  %v1087_v4 = vld [vmem:[#allocation5 + $0x20] sm:$0xff]   ;;  %v1088_v6 = vld [vmem:[#allocation5 + $0x18] sm:$0xff]   ;;  %v1089_v7 = vld [vmem:[#allocation5 + $0x10] sm:$0xff]   ;;  %s1554_s28 = scalar_lea.hbm %s1675_s2, %s919_s21  ;;  %s734_s29 = scalar_lea.sflag [#allocation4], %s1442_s30 }
  0x54   : > { %945 = vmatpush3.bf16.msra.mxu0 %v1084_v1  ;;  %1000 = vmatpush3.bf16.msra.mxu1 %v1084_v1  ;;  %v1092_v5 = vld [vmem:[%s1446_s13] sm:$0xff]   ;;  %v1090_v9 = vld [vmem:[#allocation5 + $0x8] sm:$0xff]   ;;  %v1094_v13 = vld [vmem:[%s1446_s13 + $0x10] sm:$0xff]   ;;  %s1162_s14 = scalar_lea.vmem %s1556_s6, 4096  ;;  %p1694_p7 = scmp.ne.s32.totalorder %s1687_s10, 0 }
  0x55   : > { %946 = vmatprep.subr.bf16.mxu0 %v1085_v2  ;;  %993 = vmatprep.subr.bf16.mxu1 %v1085_v2  ;;  %v1100_v8 = vld [vmem:[%s1446_s13 + $0x40] sm:$0xff]   ;;  %v1093_v11 = vld [vmem:[%s1446_s13 + $0x8] sm:$0xff]   ;;  %v1102_v14 = vld [vmem:[%s1446_s13 + $0x50] sm:$0xff]   ;;  %p1163_p12 = scmp.ne.s32.totalorder %s1556_s6, %s1162_s14  ;;  %s1289_s11 = smov [#allocation7]  }
  0x56   : > { %960 = vmatprep.mubr.bf16.mxu0 %v1092_v5  ;;  %976 = vmatprep.mubr.bf16.mxu1 %v1100_v8  ;;  %v1091_v10 = vld [vmem:[#allocation5] sm:$0xff]   ;;  %v1101_v12 = vld [vmem:[%s1446_s13 + $0x48] sm:$0xff]   ;;  %v1095_v15 = vld [vmem:[%s1446_s13 + $0x18] sm:$0xff]   ;;  %s1166_s20 = sshll.u32 %s1289_s11, 4  ;;  %s1167_s20 = int_to_ptr.vmem [resolvable:$false] %s1166_s20 }
  0x57   : > { %v1103_v16 = vld [vmem:[%s1446_s13 + $0x58] sm:$0xff]   ;;  %v1096_v17 = vld [vmem:[%s1446_s13 + $0x20] sm:$0xff]   ;;  %v1097_v19 = vld [vmem:[%s1446_s13 + $0x28] sm:$0xff]   ;;  %p1164_p8 = pnand %p1163_p12, %p1694_p7  ;;  %s1168_s25 = scalar_lea.vmem %s1167_s20, 8192 }
  0x58   : > { %947 = vmatpush3.bf16.msra.mxu0 %v1085_v2  ;;  %1001 = vmatpush3.bf16.msra.mxu1 %v1085_v2  ;;  %v1104_v18 = vld [vmem:[%s1446_s13 + $0x60] sm:$0xff]   ;;  %v1105_v20 = vld [vmem:[%s1446_s13 + $0x68] sm:$0xff]   ;;  %v1098_v21 = vld [vmem:[%s1446_s13 + $0x30] sm:$0xff]   ;;  %p1169_p11 = scmp.lt.s32.totalorder %s1556_s6, %s1167_s20  ;;  %p1170_p13 = scmp.lt.s32.totalorder %s1168_s25, %s1162_s14 }
  0x59   : > { %948 = vmatprep.subr.bf16.mxu0 %v1086_v3  ;;  %994 = vmatprep.subr.bf16.mxu1 %v1086_v3  ;;  %v1106_v22 = vld [vmem:[%s1446_s13 + $0x70] sm:$0xff]   ;;  %v1099_v23 = vld [vmem:[%s1446_s13 + $0x38] sm:$0xff]   ;;  %p1165_p10 = pneg %p1164_p8 }
  0x5a   : > { %v1107_v24 = vld [vmem:[%s1446_s13 + $0x78] sm:$0xff]   ;;  %p1171_p0 = por %p1170_p13, %p1169_p11 }
  0x5c   : > { %949 = vmatpush3.bf16.msra.mxu0 %v1086_v3  ;;  %1002 = vmatpush3.bf16.msra.mxu1 %v1086_v3  ;;  %p1172_p5 = pnand %p1171_p0, %p1165_p10 }
  0x5d   : > { %950 = vmatprep.subr.bf16.mxu0 %v1087_v4  ;;  %995 = vmatprep.subr.bf16.mxu1 %v1087_v4 }
  0x60   : > { %951 = vmatpush3.bf16.msra.mxu0 %v1087_v4  ;;  %1003 = vmatpush3.bf16.msra.mxu1 %v1087_v4 }
  0x61   : > { %952 = vmatprep.subr.bf16.mxu0 %v1088_v6  ;;  %996 = vmatprep.subr.bf16.mxu1 %v1088_v6 }
  0x64   : > { %953 = vmatpush3.bf16.msra.mxu0 %v1088_v6  ;;  %1004 = vmatpush3.bf16.msra.mxu1 %v1088_v6 }
  0x65   : > { %954 = vmatprep.subr.bf16.mxu0 %v1089_v7  ;;  %997 = vmatprep.subr.bf16.mxu1 %v1089_v7 }
  0x68   : > { %955 = vmatpush3.bf16.msra.mxu0 %v1089_v7  ;;  %1005 = vmatpush3.bf16.msra.mxu1 %v1089_v7 }
  0x69   : > { %956 = vmatprep.subr.bf16.mxu0 %v1090_v9  ;;  %998 = vmatprep.subr.bf16.mxu1 %v1090_v9 }
  0x6c   : > { %957 = vmatpush3.bf16.msra.mxu0 %v1090_v9  ;;  %1006 = vmatpush3.bf16.msra.mxu1 %v1090_v9 }
  0x6d   : > { %958 = vmatprep.subr.bf16.mxu0 %v1091_v10  ;;  %999 = vmatprep.subr.bf16.mxu1 %v1091_v10 }
  0x70   : > { %959 = vmatpush3.bf16.msra.mxu0 %v1091_v10  ;;  %1007 = vmatpush3.bf16.msra.mxu1 %v1091_v10 }
  0x73   : > { %961 = vmatmul.mubr.bf16.vlgmr.msra.gmra.mxu0 %v1093_v11  ;;  %977 = vmatmul.mubr.bf16.vlgmr.msra.gmra.mxu1 %v1101_v12 }
  0x74   : > { %964 = vmatprep.mubr.bf16.mxu0 %v1094_v13  ;;  %980 = vmatprep.mubr.bf16.mxu1 %v1102_v14 }
  0x7b   : > { %965 = vmatmul.mubr.bf16.gmra.mxu0 %v1095_v15  ;;  %981 = vmatmul.mubr.bf16.gmra.mxu1 %v1103_v16 }
  0x7c   : > { %968 = vmatprep.mubr.bf16.mxu0 %v1096_v17  ;;  %984 = vmatprep.mubr.bf16.mxu1 %v1104_v18 }
  0x83   : > { %969 = vmatmul.mubr.bf16.gmra.mxu0 %v1097_v19  ;;  %985 = vmatmul.mubr.bf16.gmra.mxu1 %v1105_v20 }
  0x84   : > { %972 = vmatprep.mubr.bf16.mxu0 %v1098_v21  ;;  %988 = vmatprep.mubr.bf16.mxu1 %v1106_v22 }
  0x8b   : > { %973 = vmatmul.mubr.bf16.gmra.mxu0 %v1099_v23  ;;  %989 = vmatmul.mubr.bf16.gmra.mxu1 %v1107_v24 }
 0x133   : > { %v962_v25 = vpop.f32.mrf.mxu0  ;;  %v1477_v26 = vpop.f32.mrf.mxu1 }
 0x134   : > { %591 = vst [vmem:[%s1457_s5 + $0x10] sm:$0xff] %v962_v25  ;;  %607 = vst [vmem:[%s1457_s5 + $0x90] sm:$0xff] %v1477_v26  ;;  %v664_v38 = vmul.f32 %v962_v25, %v962_v25 }
 0x135   : > { %v462_v27 = vpop.f32.mrf.mxu0  ;;  %v1482_v28 = vpop.f32.mrf.mxu1 }
 0x136   : > { %589 = vst [vmem:[%s1457_s5] sm:$0xff] %v462_v27  ;;  %605 = vst [vmem:[%s1457_s5 + $0x80] sm:$0xff] %v1482_v28  ;;  %v662_v33 = vmul.f32 %v462_v27, %v462_v27 }
 0x137   : > { %v963_v29 = vpop.f32.mrf.mxu0  ;;  %v1487_v30 = vpop.f32.mrf.mxu1 }
 0x138   : > { %592 = vst [vmem:[%s1457_s5 + $0x18] sm:$0xff] %v963_v29  ;;  %608 = vst [vmem:[%s1457_s5 + $0x98] sm:$0xff] %v1487_v30  ;;  %v665_v43 = vmul.f32 %v963_v29, %v963_v29 }
 0x139   : > { %v465_v31 = vpop.f32.mrf.mxu0  ;;  %v1492_v32 = vpop.f32.mrf.mxu1 }
 0x13a   : > { %590 = vst [vmem:[%s1457_s5 + $0x8] sm:$0xff] %v465_v31  ;;  %v622_v34 = vadd.f32 %v465_v31, %v462_v27  ;;  %v663_v35 = vmul.f32 %v465_v31, %v465_v31  ;;  %606 = vst [vmem:[%s1457_s5 + $0x88] sm:$0xff] %v1492_v32 }
 0x13b   : > { %v966_v36 = vpop.f32.mrf.mxu0  ;;  %v1497_v37 = vpop.f32.mrf.mxu1 }
 0x13c   : > { %v623_v39 = vadd.f32 %v962_v25, %v622_v34  ;;  %v694_v40 = vadd.f32 %v663_v35, %v662_v33  ;;  %595 = vst [vmem:[%s1457_s5 + $0x30] sm:$0xff] %v966_v36  ;;  %611 = vst [vmem:[%s1457_s5 + $0xb0] sm:$0xff] %v1497_v37  ;;  %v668_v58 = vmul.f32 %v966_v36, %v966_v36 }
 0x13d   : > { %v478_v41 = vpop.f32.mrf.mxu0  ;;  %v1502_v42 = vpop.f32.mrf.mxu1 }
 0x13e   : > { %v695_v44 = vadd.f32 %v694_v40, %v664_v38  ;;  %593 = vst [vmem:[%s1457_s5 + $0x20] sm:$0xff] %v478_v41  ;;  %v624_v45 = vadd.f32 %v963_v29, %v623_v39  ;;  %609 = vst [vmem:[%s1457_s5 + $0xa0] sm:$0xff] %v1502_v42  ;;  %v666_v49 = vmul.f32 %v478_v41, %v478_v41 }
 0x13f   : > { %v967_v46 = vpop.f32.mrf.mxu0  ;;  %v1507_v47 = vpop.f32.mrf.mxu1 }
 0x140   : > { %v625_v48 = vadd.f32 %v624_v45, %v478_v41  ;;  %v696_v50 = vadd.f32 %v695_v44, %v665_v43  ;;  %596 = vst [vmem:[%s1457_s5 + $0x38] sm:$0xff] %v967_v46  ;;  %612 = vst [vmem:[%s1457_s5 + $0xb8] sm:$0xff] %v1507_v47  ;;  %v669_v63 = vmul.f32 %v967_v46, %v967_v46 }
 0x141   : > { %v481_v51 = vpop.f32.mrf.mxu0  ;;  %v1512_v52 = vpop.f32.mrf.mxu1 }
 0x142   : > { %v697_v53 = vadd.f32 %v696_v50, %v666_v49  ;;  %594 = vst [vmem:[%s1457_s5 + $0x28] sm:$0xff] %v481_v51  ;;  %v626_v54 = vadd.f32 %v625_v48, %v481_v51  ;;  %v667_v55 = vmul.f32 %v481_v51, %v481_v51  ;;  %610 = vst [vmem:[%s1457_s5 + $0xa8] sm:$0xff] %v1512_v52 }
 0x143   : > { %v970_v56 = vpop.f32.mrf.mxu0  ;;  %v1517_v57 = vpop.f32.mrf.mxu1 }
 0x144   : > { %v627_v59 = vadd.f32 %v966_v36, %v626_v54  ;;  %v698_v60 = vadd.f32 %v697_v53, %v667_v55  ;;  %599 = vst [vmem:[%s1457_s5 + $0x50] sm:$0xff] %v970_v56  ;;  %615 = vst [vmem:[%s1457_s5 + $0xd0] sm:$0xff] %v1517_v57  ;;  %v672_v14 = vmul.f32 %v970_v56, %v970_v56 }
 0x145   : > { %v494_v61 = vpop.f32.mrf.mxu0  ;;  %v1522_v62 = vpop.f32.mrf.mxu1 }
 0x146   : > { %v699_v0 = vadd.f32 %v698_v60, %v668_v58  ;;  %597 = vst [vmem:[%s1457_s5 + $0x40] sm:$0xff] %v494_v61  ;;  %v628_v1 = vadd.f32 %v967_v46, %v627_v59  ;;  %613 = vst [vmem:[%s1457_s5 + $0xc0] sm:$0xff] %v1522_v62  ;;  %v670_v5 = vmul.f32 %v494_v61, %v494_v61 }
 0x147   : > { %v971_v2 = vpop.f32.mrf.mxu0  ;;  %v1527_v3 = vpop.f32.mrf.mxu1 }
 0x148   : > { %v629_v4 = vadd.f32 %v628_v1, %v494_v61  ;;  %v700_v6 = vadd.f32 %v699_v0, %v669_v63  ;;  %600 = vst [vmem:[%s1457_s5 + $0x58] sm:$0xff] %v971_v2  ;;  %616 = vst [vmem:[%s1457_s5 + $0xd8] sm:$0xff] %v1527_v3  ;;  %v673_v19 = vmul.f32 %v971_v2, %v971_v2 }
 0x149   : > { %v497_v7 = vpop.f32.mrf.mxu0  ;;  %v1532_v8 = vpop.f32.mrf.mxu1 }
 0x14a   : > { %v701_v9 = vadd.f32 %v700_v6, %v670_v5  ;;  %598 = vst [vmem:[%s1457_s5 + $0x48] sm:$0xff] %v497_v7  ;;  %v630_v10 = vadd.f32 %v629_v4, %v497_v7  ;;  %v671_v11 = vmul.f32 %v497_v7, %v497_v7  ;;  %614 = vst [vmem:[%s1457_s5 + $0xc8] sm:$0xff] %v1532_v8 }
 0x14b   : > { %v974_v12 = vpop.f32.mrf.mxu0  ;;  %v1537_v13 = vpop.f32.mrf.mxu1 }
 0x14c   : > { %v631_v15 = vadd.f32 %v970_v56, %v630_v10  ;;  %v702_v16 = vadd.f32 %v701_v9, %v671_v11  ;;  %603 = vst [vmem:[%s1457_s5 + $0x70] sm:$0xff] %v974_v12  ;;  %619 = vst [vmem:[%s1457_s5 + $0xf0] sm:$0xff] %v1537_v13 }
 0x14d   : > { %v510_v17 = vpop.f32.mrf.mxu0  ;;  %v1544_v18 = vpop.f32.mrf.mxu1 }
 0x14e   : > { %v703_v20 = vadd.f32 %v702_v16, %v672_v14  ;;  %601 = vst [vmem:[%s1457_s5 + $0x60] sm:$0xff] %v510_v17  ;;  %v632_v21 = vadd.f32 %v971_v2, %v631_v15  ;;  %617 = vst [vmem:[%s1457_s5 + $0xe0] sm:$0xff] %v1544_v18  ;;  %v674_v25 = vmul.f32 %v510_v17, %v510_v17 }
 0x14f   : > { %v975_v22 = vpop.f32.mrf.mxu0  ;;  %v1549_v23 = vpop.f32.mrf.mxu1 }
 0x150   : > { %v633_v24 = vadd.f32 %v632_v21, %v510_v17  ;;  %v704_v27 = vadd.f32 %v703_v20, %v673_v19  ;;  %604 = vst [vmem:[%s1457_s5 + $0x78] sm:$0xff] %v975_v22  ;;  %620 = vst [vmem:[%s1457_s5 + $0xf8] sm:$0xff] %v1549_v23 }
 0x151   : > { %v513_v29 = vpop.f32.mrf.mxu0  ;;  %v1561_v31 = vpop.f32.mrf.mxu1 }
 0x152   : > { %v705_v33 = vadd.f32 %v704_v27, %v674_v25  ;;  %602 = vst [vmem:[%s1457_s5 + $0x68] sm:$0xff] %v513_v29  ;;  %v634_v34 = vadd.f32 %v633_v24, %v513_v29  ;;  %v675_v35 = vmul.f32 %v513_v29, %v513_v29  ;;  %618 = vst [vmem:[%s1457_s5 + $0xe8] sm:$0xff] %v1561_v31 }
 0x153   : > { %1175 = shalt.err (!%p1172_p5)
}
 0x154   : > { %s1176_s7 = scalar_lea.hbm %s1554_s28, 4096  ;;  %s1180_s13 = scalar_lea.hbm %s1675_s2, 8192 }
 0x155   : > { %p1177_p2 = scmp.ne.s32.totalorder %s1554_s28, %s1176_s7  ;;  %p1181_p6 = scmp.lt.s32.totalorder %s1554_s28, %s1675_s2 }
 0x156   : > { %p1182_p9 = scmp.lt.s32.totalorder %s1180_s13, %s1176_s7 }
 0x157   : > { %p1178_p1 = pnand %p1177_p2, %p1694_p7 }
 0x158   : > { %p1183_p3 = por %p1182_p9, %p1181_p6 }
 0x159   : > { %p1179_p4 = pneg %p1178_p1 }
 0x15b   : > { %p1184_p12 = pnand %p1183_p3, %p1179_p4 }
 0x15d   : > { %1187 = shalt.err (!%p1184_p12)
}
 0x15e   : > { %s1290_s21 = smov 128   ;;  %s1291_s24 = smov 8   ;;  %v676_v36 = vmul.f32 %v974_v12, %v974_v12  ;;  %v635_v38 = vadd.f32 %v974_v12, %v634_v34  ;;  %v706_v39 = vadd.f32 %v705_v33, %v675_v35  ;;  %v677_v40 = vmul.f32 %v975_v22, %v975_v22 }
 0x15f   : > { %1014 = dma.vmem_to_hbm [thread:$0]  (%p1694_p7), %s1556_s6, 4096, %s1554_s28, %s734_s29, %s1290_s21, %s1290_s21, %s1291_s24   ;;  %v678_v44 = vmul.f32 %v1482_v28, %v1482_v28  ;;  %v679_v49 = vmul.f32 %v1492_v32, %v1492_v32  ;;  %v680_v51 = vmul.f32 %v1477_v26, %v1477_v26  ;;  %v681_v55 = vmul.f32 %v1487_v30, %v1487_v30 }
 0x160   : > { %v636_v41 = vadd.f32 %v975_v22, %v635_v38  ;;  %v707_v43 = vadd.f32 %v706_v39, %v676_v36  ;;  %v682_v59 = vmul.f32 %v1502_v42, %v1502_v42  ;;  %v683_v63 = vmul.f32 %v1512_v52, %v1512_v52  ;;  %v621_v39 = vld [vmem:[#allocation8] sm:$0x1]  ;;  %s1292_s10 = smov [#allocation8]   ;;  %s1293_s6 = smov [#allocation10]  }
 0x161   : > { %v686_v5 = vmul.f32 %v1522_v62, %v1522_v62  ;;  %v687_v9 = vmul.f32 %v1532_v8, %v1532_v8  ;;  %v690_v15 = vmul.f32 %v1544_v18, %v1544_v18  ;;  %v691_v19 = vmul.f32 %v1561_v31, %v1561_v31  ;;  %s761_s30 = sshll.u32 %s1292_s10, 4  ;;  %s772_s26 = sshll.u32 %s1293_s6, 4  ;;  %s762_s30 = int_to_ptr.vmem [resolvable:$true] %s761_s30  ;;  %s773_s26 = int_to_ptr.vmem [resolvable:$true] %s772_s26 }
 0x162   : > { %v708_v45 = vadd.f32 %v707_v43, %v677_v40  ;;  %v637_v46 = vadd.f32 %v636_v41, %v1482_v28  ;;  %v661_v41 = vld [vmem:[#allocation10] sm:$0x1]  ;;  %s1188_s28 = scalar_lea.vmem %s762_s30, 16  ;;  %p1695_p8 = scmp.eq.s32.totalorder %s1340_s19, 1 }
 0x163   : > { %p1189_p7 = scmp.ne.s32.totalorder %s762_s30, %s1188_s28  ;;  %s1194_s29 = scalar_lea.vmem %s762_s30, 32 }
 0x164   : > { %v638_v48 = vadd.f32 %v637_v46, %v1492_v32  ;;  %v709_v50 = vadd.f32 %v708_v45, %v678_v44  ;;  %p1195_p13 = scmp.lt.s32.totalorder %s762_s30, %s762_s30  ;;  %p1196_p0 = scmp.lt.s32.totalorder %s1194_s29, %s1188_s28 }
 0x165   : > { %p1190_p10 = pnand %p1189_p7, %p1695_p8 }
 0x166   : > { %v639_v53 = vadd.f32 %v1477_v26, %v638_v48  ;;  %v710_v54 = vadd.f32 %v709_v50, %v679_v49  ;;  %v684_v26 = vmul.f32 %v1497_v37, %v1497_v37  ;;  %p1197_p5 = por %p1196_p0, %p1195_p13 }
 0x167   : > { %p1191_p11 = pneg %p1190_p10 }
 0x168   : > { %v711_v56 = vadd.f32 %v710_v54, %v680_v51  ;;  %v640_v58 = vadd.f32 %v1487_v30, %v639_v53  ;;  %v685_v30 = vmul.f32 %v1507_v47, %v1507_v47 }
 0x169   : > { %p1198_p2 = pnand %p1197_p5, %p1191_p11 }
 0x16a   : > { %v641_v28 = vadd.f32 %v640_v58, %v1502_v42  ;;  %v712_v60 = vadd.f32 %v711_v56, %v681_v55 }
 0x16c   : > { %v713_v32 = vadd.f32 %v712_v60, %v682_v59  ;;  %v642_v61 = vadd.f32 %v641_v28, %v1512_v52 }
 0x16e   : > { %v643_v0 = vadd.f32 %v1497_v37, %v642_v61  ;;  %v714_v1 = vadd.f32 %v713_v32, %v683_v63  ;;  %v688_v37 = vmul.f32 %v1517_v57, %v1517_v57 }
 0x170   : > { %v715_v2 = vadd.f32 %v714_v1, %v684_v26  ;;  %v644_v4 = vadd.f32 %v1507_v47, %v643_v0  ;;  %v689_v47 = vmul.f32 %v1527_v3, %v1527_v3 }
 0x172   : > { %v645_v42 = vadd.f32 %v644_v4, %v1522_v62  ;;  %v716_v6 = vadd.f32 %v715_v2, %v685_v30 }
 0x174   : > { %v717_v7 = vadd.f32 %v716_v6, %v686_v5  ;;  %v646_v52 = vadd.f32 %v645_v42, %v1532_v8 }
 0x176   : > { %v647_v10 = vadd.f32 %v1517_v57, %v646_v52  ;;  %v718_v11 = vadd.f32 %v717_v7, %v687_v9  ;;  %v692_v57 = vmul.f32 %v1537_v13, %v1537_v13 }
 0x178   : > { %v719_v12 = vadd.f32 %v718_v11, %v688_v37  ;;  %v648_v14 = vadd.f32 %v1527_v3, %v647_v10  ;;  %v693_v3 = vmul.f32 %v1549_v23, %v1549_v23 }
 0x17a   : > { %v649_v62 = vadd.f32 %v648_v14, %v1544_v18  ;;  %v720_v16 = vadd.f32 %v719_v12, %v689_v47 }
 0x17c   : > { %v721_v17 = vadd.f32 %v720_v16, %v690_v15  ;;  %v650_v8 = vadd.f32 %v649_v62, %v1561_v31 }
 0x17e   : > { %v651_v20 = vadd.f32 %v1537_v13, %v650_v8  ;;  %v722_v21 = vadd.f32 %v721_v17, %v691_v19 }
 0x180   : > { %v652_v22 = vadd.f32 %v1549_v23, %v651_v20  ;;  %v723_v24 = vadd.f32 %v722_v21, %v692_v57 }
 0x182   : > { %v653_v18 = vrot.slane %v652_v22, 4  ;;  %v724_v25 = vadd.f32 %v723_v24, %v693_v3 }
 0x184   : > { %v654_v27 = vadd.f32 %v653_v18, %v652_v22  ;;  %v725_v29 = vrot.slane %v724_v25, 4 }
 0x186   : > { %v655_v33 = vrot.slane %v654_v27, 2  ;;  %v726_v34 = vadd.f32 %v725_v29, %v724_v25 }
 0x188   : > { %v656_v35 = vadd.f32 %v655_v33, %v654_v27  ;;  %v727_v31 = vrot.slane %v726_v34, 2 }
 0x18a   : > { %v657_v36 = vrot.slane %v656_v35, 1  ;;  %v728_v38 = vadd.f32 %v727_v31, %v726_v34 }
 0x18c   : > { %v658_v13 = vadd.f32 %v657_v36, %v656_v35  ;;  %v729_v40 = vrot.slane %v728_v38, 1 }
 0x18e   : > { %v659_v23 = vadd.f32 %v658_v13, %v621_v39  ;;  %v730_v43 = vadd.f32 %v729_v40, %v728_v38 }
 0x190   : > { %660 = vst [vmem:[#allocation8] sm:$0x1] %v659_v23  ;;  %v731_v44 = vadd.f32 %v730_v43, %v661_v41 }
 0x191   : > { %1201 = shalt.err (!%p1198_p2)
}
 0x192   : > { %p1696_p1 = pmov %p1695_p8  ;;  %732 = vst [vmem:[#allocation10] sm:$0x1] %v731_v44  ;;  %s1212_s20 = scalar_lea.vmem %s773_s26, 16 }
 0x193   : > { %p1213_p4 = scmp.ne.s32.totalorder %s773_s26, %s1212_s20  ;;  %s1218_s25 = scalar_lea.vmem %s773_s26, 32 }
 0x194   : > { %1016 = dma.vmem_to_hbm [thread:$0]  (%p1696_p1), %s762_s30, 16, %s1676_s3, [#allocation9]  }
 0x195   : > { %p1697_p6 = pmov %p1696_p1  ;;  %p1219_p12 = scmp.lt.s32.totalorder %s773_s26, %s773_s26 }
 0x196   : > { %p1220_p7 = scmp.lt.s32.totalorder %s1218_s25, %s1212_s20 }
 0x197   : > { %p1214_p9 = pnand %p1213_p4, %p1697_p6 }
 0x198   : > { %p1221_p8 = por %p1220_p7, %p1219_p12 }
 0x199   : > { %p1215_p3 = pneg %p1214_p9 }
 0x19b   : > { %p1222_p10 = pnand %p1221_p8, %p1215_p3 }
 0x19d   : > { %1225 = shalt.err (!%p1222_p10)
}
 0x19e   : > { %p1698_p11 = pmov %p1696_p1  ;;  %p1699_p13 = pmov %p1696_p1 }
 0x1a0   : > { %1018 = dma.vmem_to_hbm [thread:$0]  (%p1698_p11), %s773_s26, 16, %s1677_s4, [#allocation9]  }
 0x1a1   : > { %1261 = dma.done.wait (%p1699_p13), [#allocation9], 32   ;;  %p1700_p0 = pmov %p1696_p1 }
 0x1a3   : > { %1263 = vsyncadd (%p1700_p0), [#allocation9], 4294967264 }
 0x1a4 PF: > { %s792_s12 = sand.u32 1, %s1270_s15   ;;  %p1701_p5 = scmp.ne.s32.totalorder %s1683_s22, 0 }
 0x1a5   : > { %p1702_p2 = scmp.ge.s32.totalorder %s1282_s18, 2  ;;  %s793_s13 = scalar_lea.sflag [#allocation4], %s792_s12 }
 0x1a7   : > { %p1033_p1 = pnand %p1702_p2, %p1701_p5 }
 0x1a9   : > { %p1034_p4 = pneg %p1033_p1 }
 0x1ab   : > { %1265 = dma.done.wait (%p1034_p4), %s793_s13, 4096  }
 0x1ac   : > { %1267 = vsyncadd (%p1034_p4), %s793_s13, 4294963200  ;;  %p20_p6 = scmp.ge.s32.totalorder %s1374_s27, 4   ;;  %s1703_s15 = smov %s1274_s16 }
 0x1ad   : > { %s1704_s16 = smov %s1278_s17  ;;  %s1705_s17 = smov %s1394_s9 }
 0x1ae   : > { %s1706_s18 = smov %s1374_s27  ;;  %22 = sbr.rel (!%p20_p6) target bundleno = 7 (0x7), region = 97 }
 0x1b3   :  { %798 = vsyncpa [#allocation3], 1 }
 0x1b4   :  { %800 = vsyncpa [#allocation3 + $0x1], 1 }
 0x1b5   :  { %801 = vsyncpa [#allocation6], 1 }
 0x1b6   :  { %802 = vsyncpa [#allocation4], 1 }
 0x1b7   :  { %804 = vsyncpa [#allocation4 + $0x1], 1 }
 0x1b8   :  { %805 = vsyncpa [#allocation9], 1 }

</bundles_post_ra>
